<compile_context>
chip_gen: v7x
topology: tpu7x:2x2x1
jax: 0.10.0
libtpu: 0.0.40
codegen_flags: <defaults>
</compile_context>

<pallas_src>
import jax
import jax.numpy as jnp
from jax.experimental import pallas as pl
from jax.experimental.pallas import tpu as pltpu


# ---------------------------------------------------------------------------
# Fused kernel: one row-tile of  y = x @ W + bias  (f32 accumulation on MXU).
# ---------------------------------------------------------------------------
def _linear_bias_kernel(x_ref, w_ref, b_ref, o_ref):
    acc = jnp.dot(x_ref[...], w_ref[...], preferred_element_type=jnp.float32)
    o_ref[...] = (acc + b_ref[...]).astype(o_ref.dtype)   # b_ref is (1, cols): broadcasts


def _pallas_linear(x2d, w, bias_row, *, max_tm=512, compute_dtype=jnp.float32):
    """y2d = x2d @ w + bias_row, rows tiled over a 1-D 'parallel' grid."""
    rows, kdim = x2d.shape
    k2, cols = w.shape
    assert kdim == k2, (kdim, k2)
    assert bias_row.shape == (1, cols), bias_row.shape

    # Big row tiles: per-grid-step overhead dominates at small tiles.
    if rows >= max_tm:
        tm = max_tm
    else:
        tm = max(8, ((rows + 7) // 8) * 8)        # round tiny row counts up to sublane
    n_tiles = pl.cdiv(rows, tm)
    padded_rows = n_tiles * tm
    if padded_rows != rows:
        x2d = jnp.pad(x2d, ((0, padded_rows - rows), (0, 0)))

    if compute_dtype != jnp.float32:              # optional bf16 MXU inputs (v6e/v7x)
        x2d = x2d.astype(compute_dtype)
        w = w.astype(compute_dtype)

    out = pl.pallas_call(
        _linear_bias_kernel,
        out_shape=jax.ShapeDtypeStruct((padded_rows, cols), jnp.float32),
        grid_spec=pltpu.PrefetchScalarGridSpec(
            num_scalar_prefetch=0,
            grid=(n_tiles,),
            in_specs=[
                pl.BlockSpec((tm, kdim), lambda i: (i, 0)),   # x row tile
                pl.BlockSpec((kdim, cols), lambda i: (0, 0)),  # full W, resident
                pl.BlockSpec((1, cols), lambda i: (0, 0)),     # bias row, resident
            ],
            out_specs=pl.BlockSpec((tm, cols), lambda i: (i, 0)),  # lane-dense output
        ),
        compiler_params=pltpu.CompilerParams(
            dimension_semantics=("parallel",),
        ),
    )(x2d, w, bias_row)

    return out[:rows] if padded_rows != rows else out


# ---------------------------------------------------------------------------
# x-independent parameter preprocessing (hoisted out of the forward; run once).
# ---------------------------------------------------------------------------
def prepare_tt_linear_params(cores, bias, in_modes, out_modes):
    """Collapse the TT cores into the dense (in_features, out_features) matrix
    (standard t3nsor full() ordering: n1/m1 most significant) and reshape the
    bias to a (1, out_features) row for in-kernel broadcasting."""
    G1, G2, G3 = cores
    n1, n2, n3 = in_modes
    m1, m2, m3 = out_modes
    W6 = jnp.einsum("ipa,ajqb,bkl->ijkpql", G1[0], G2, G3[:, :, :, 0])
    W = W6.reshape(n1 * n2 * n3, m1 * m2 * m3).astype(jnp.float32)
    return W, bias.reshape(1, -1).astype(jnp.float32)


# ---------------------------------------------------------------------------
# TTLinearSeq forward: flatten (batch, seq) -> one fused Pallas matmul+bias.
# ---------------------------------------------------------------------------
def tt_linear_seq_forward(x, W, bias_row, *, max_tm=512, compute_dtype=jnp.float32):
    B, S, IN = x.shape
    y2d = _pallas_linear(x.reshape(B * S, IN), W, bias_row,
                         max_tm=max_tm, compute_dtype=compute_dtype)
    return y2d.reshape(B, S, -1)


# ---------------------------------------------------------------------------
# Pure-JAX reference via the tt_dense_matmul-style 3-step chain (independent
# contraction path from the einsum used above) for cross-verification.
# ---------------------------------------------------------------------------
def tt_linear_seq_reference(x, cores, bias, in_modes, out_modes, tt_ranks):
    n1, n2, n3 = in_modes
    m1, m2, m3 = out_modes
    r0, r1, r2, r3 = tt_ranks
    G1, G2, G3 = cores
    B, S, IN = x.shape
    K = B * S

    C3 = jnp.transpose(G3[:, :, :, 0], (1, 2, 0)).reshape(n3, m3 * r2)
    C2 = jnp.transpose(G2, (1, 3, 2, 0)).reshape(n2 * r2, m2 * r1)
    C1 = jnp.transpose(G1[0], (0, 2, 1)).reshape(n1 * r1, m1)

    d = x.reshape(K * n1 * n2, n3) @ C3
    d = d.reshape(K, n1, n2, m3, r2)
    d = jnp.transpose(d, (3, 0, 1, 2, 4)).reshape(m3 * K * n1, n2 * r2) @ C2
    d = d.reshape(m3, K, n1, m2, r1)
    d = jnp.transpose(d, (3, 0, 1, 2, 4)).reshape(m2 * m3 * K, n1 * r1) @ C1
    y = d.reshape(m2, m3, K, m1)
    y = jnp.transpose(y, (2, 3, 0, 1)).reshape(B, S, m1 * m2 * m3) + bias
    return y


if __name__ == "__main__":
    # Module config (auto_shape of 64 with d=3 -> [4, 4, 4]).
    d = 3
    tt_rank = 8
    in_features, out_features = 64, 64
    in_modes = (4, 4, 4)       # n1, n2, n3
    out_modes = (4, 4, 4)      # m1, m2, m3
    tt_ranks = (1, tt_rank, tt_rank, 1)

    batch, seq = 2, 8

    # Deterministic synthetic parameter init (glorot-style TT scaling).
    key = jax.random.PRNGKey(0)
    k1, k2, k3, kx = jax.random.split(key, 4)
    lamb = 2.0 / (in_features + out_features)
    core_std = (lamb / (tt_rank * tt_rank)) ** (1.0 / (2 * d))
    G1 = core_std * jax.random.normal(
        k1, (1, in_modes[0], out_modes[0], tt_rank), jnp.float32)
    G2 = core_std * jax.random.normal(
        k2, (tt_rank, in_modes[1], out_modes[1], tt_rank), jnp.float32)
    G3 = core_std * jax.random.normal(
        k3, (tt_rank, in_modes[2], out_modes[2], 1), jnp.float32)
    bias = 0.001 * jnp.ones((out_features,), jnp.float32)
    cores = (G1, G2, G3)

    x = jax.random.normal(kx, (batch, seq, in_features), jnp.float32)

    # Hoisted, x-independent parameter preprocessing (done once).
    W, bias_row = prepare_tt_linear_params(cores, bias, in_modes, out_modes)
    W = jax.block_until_ready(W)

    forward = jax.jit(tt_linear_seq_forward,
                      static_argnames=("max_tm", "compute_dtype"))
    # TODO(synk): on v6e/v7x, pass compute_dtype=jnp.bfloat16 for bf16-in /
    # f32-accumulate MXU matmuls (keep f32 on v5e).
    y = forward(x, W, bias_row)
    y = jax.block_until_ready(y)

    y_ref = tt_linear_seq_reference(x, cores, bias, in_modes, out_modes, tt_ranks)
    assert y.shape == (batch, seq, out_features), y.shape
    assert jnp.allclose(y, y_ref, atol=1e-4, rtol=1e-4), float(
        jnp.max(jnp.abs(y - y_ref)))

    print("KERNEL_OK")
</pallas_src>

<mosaic_0001>
module attributes {stable_mosaic.version = 11 : i64} {
  func.func @_linear_bias_kernel(%arg0: i32, %arg1: memref<16x64xf32, #tpu.memory_space<vmem>>, %arg2: memref<64x64xf32, #tpu.memory_space<vmem>>, %arg3: memref<1x64xf32, #tpu.memory_space<vmem>>, %arg4: memref<16x64xf32, #tpu.memory_space<vmem>>) attributes {dimension_semantics = [#tpu.dimension_semantics<parallel>], iteration_bounds = array<i64: 1>, scalar_prefetch = 0 : i64, scratch_operands = 0 : i64, tpu.core_type = #tpu.core_type<tc>, window_params = [{transform_indices = @transform_0, window_bounds = array<i64: 16, 64>}, {pipeline_mode = #tpu.pipeline_mode<synchronous>, transform_indices = @transform_1, window_bounds = array<i64: 64, 64>}, {pipeline_mode = #tpu.pipeline_mode<synchronous>, transform_indices = @transform_2, window_bounds = array<i64: 1, 64>}, {transform_indices = @transform_3, window_bounds = array<i64: 16, 64>}]} {
    %c0 = arith.constant 0 : index
    %c0_0 = arith.constant 0 : index
    %0 = vector.load %arg1[%c0, %c0_0] : memref<16x64xf32, #tpu.memory_space<vmem>>, vector<16x64xf32>
    %c0_1 = arith.constant 0 : index
    %c0_2 = arith.constant 0 : index
    %1 = vector.load %arg2[%c0_1, %c0_2] : memref<64x64xf32, #tpu.memory_space<vmem>>, vector<64x64xf32>
    %cst = arith.constant dense<0.000000e+00> : vector<16x64xf32>
    %2 = tpu.matmul %0, %1, %cst {dimension_numbers = #tpu.dot_dimension_numbers<[1], [0], [0], [1], [0, 0, 1, 1], [], []>} : vector<16x64xf32>, vector<64x64xf32>, vector<16x64xf32> -> vector<16x64xf32>
    %c0_3 = arith.constant 0 : index
    %c0_4 = arith.constant 0 : index
    %3 = vector.load %arg3[%c0_3, %c0_4] : memref<1x64xf32, #tpu.memory_space<vmem>>, vector<1x64xf32>
    %4 = vector.broadcast %3 : vector<1x64xf32> to vector<16x64xf32>
    %5 = arith.addf %2, %4 : vector<16x64xf32>
    %c0_5 = arith.constant 0 : index
    %c0_6 = arith.constant 0 : index
    %6 = vector.load %arg4[%c0_5, %c0_6] : memref<16x64xf32, #tpu.memory_space<vmem>>, vector<16x64xf32>
    tpu.vector_store %arg4[%c0_5, %c0_6], %5 {strides = array<i32>} : memref<16x64xf32, #tpu.memory_space<vmem>>, vector<16x64xf32>,
    return
  }
  func.func @transform_0(%arg0: i32) -> (i32, i32) {
    %c0_i32 = arith.constant 0 : i32
    %c0_i32_0 = arith.constant 0 : i32
    return %arg0, %c0_i32 : i32, i32
  }
  func.func @transform_1(%arg0: i32) -> (i32, i32) {
    %c0_i32 = arith.constant 0 : i32
    %c0_i32_0 = arith.constant 0 : i32
    %c0_i32_1 = arith.constant 0 : i32
    return %c0_i32, %c0_i32_0 : i32, i32
  }
  func.func @transform_2(%arg0: i32) -> (i32, i32) {
    %c0_i32 = arith.constant 0 : i32
    %c0_i32_0 = arith.constant 0 : i32
    %c0_i32_1 = arith.constant 0 : i32
    return %c0_i32, %c0_i32_0 : i32, i32
  }
  func.func @transform_3(%arg0: i32) -> (i32, i32) {
    %c0_i32 = arith.constant 0 : i32
    %c0_i32_0 = arith.constant 0 : i32
    return %arg0, %c0_i32 : i32, i32
  }
}

</mosaic_0001>

<bundles_post_ra>
// kernel: tt_linear_seq_forward.1
= control target key start
LH: loop header
LB: loop body
LE: loop exit
PB: predicated region body
PF: predicated region fallthrough
CT: control target
= control target key end

     0   :  { %8 = vsyncpa [#allocation3], 0  ;;  %s364_s0 = inlined_call_operand.hbm [shape: f32[16,64], index: 0, kind: input, shape index: {}]   ;;  %s365_s1 = inlined_call_operand.hbm [shape: f32[64,64], index: 1, kind: input, shape index: {}]   ;;  %s366_s2 = inlined_call_operand.vmem [shape: f32[1,64], index: 2, kind: input, shape index: {}]   ;;  %s367_s3 = inlined_call_operand.hbm [shape: f32[16,64], index: 3, kind: output, shape index: {}]  }
   0x1   :  { %9 = vsyncpa [#allocation6], 0 }
   0x2   :  { %10 = vsyncpa [#allocation4], 0  ;;  %s287_s12 = smov [#allocation2]   ;;  %s215_s16 = scalar_lea.hbm %s364_s0, 256 }
   0x3   :  { %s16_s13 = sshll.u32 %s287_s12, 4  ;;  %p216_p0 = scmp.ne.s32.totalorder %s364_s0, %s215_s16  ;;  %s17_s13 = int_to_ptr.vmem [resolvable:$true] %s16_s13 }
   0x4   :  { %p219_p1 = scmp.lt.u32.totalorder %s215_s16, %s364_s0 }
   0x6   :  { %p221_p2 = pnand %p219_p1, %p216_p0 }
   0x8   :  { %224 = shalt.err (!%p221_p2)
}
   0x9   :  { %s225_s21 = scalar_lea.vmem %s17_s13, 256  ;;  %p230_p4 = scmp.lt.s32.totalorder %s17_s13, %s17_s13 }
   0xa   :  { %p226_p3 = scmp.ne.s32.totalorder %s17_s13, %s225_s21  ;;  %p231_p5 = scmp.lt.s32.totalorder %s225_s21, %s225_s21 }
   0xc   :  { %p232_p6 = por %p231_p5, %p230_p4 }
   0xe   :  { %p233_p7 = pnand %p232_p6, %p226_p3 }
  0x10   :  { %236 = shalt.err (!%p233_p7)
}
  0x11   :  { %s288_s22 = smov 128   ;;  %s289_s23 = smov 8  }
  0x12   :  { %22 = dma.hbm_to_vmem [thread:$0]  %s364_s0, 256, %s17_s13, [#allocation3], %s288_s22, %s288_s22, %s289_s23  }
  0x13   :  { %s290_s26 = smov [#allocation5]   ;;  %s237_s30 = scalar_lea.hbm %s365_s1, 1024 }
  0x14   :  { %s28_s27 = sshll.u32 %s290_s26, 4  ;;  %p238_p8 = scmp.ne.s32.totalorder %s365_s1, %s237_s30  ;;  %s29_s27 = int_to_ptr.vmem [resolvable:$true] %s28_s27 }
  0x15   :  { %p241_p9 = scmp.lt.u32.totalorder %s237_s30, %s365_s1 }
  0x17   :  { %p243_p10 = pnand %p241_p9, %p238_p8 }
  0x19   :  { %246 = shalt.err (!%p243_p10)
}
  0x1a   :  { %s247_s8 = scalar_lea.vmem %s29_s27, 1024  ;;  %p252_p12 = scmp.lt.s32.totalorder %s29_s27, %s29_s27 }
  0x1b   :  { %p248_p11 = scmp.ne.s32.totalorder %s29_s27, %s247_s8  ;;  %p253_p13 = scmp.lt.s32.totalorder %s247_s8, %s247_s8 }
  0x1d   :  { %p254_p0 = por %p253_p13, %p252_p12 }
  0x1f   :  { %p255_p1 = pnand %p254_p0, %p248_p11 }
  0x21   :  { %258 = shalt.err (!%p255_p1)
}
  0x22   :  { %34 = dma.hbm_to_vmem [thread:$0]  %s365_s1, 1024, %s29_s27, [#allocation6], %s288_s22, %s288_s22, %s289_s23  }
  0x23   :  { %281 = dma.done.wait [#allocation3], 256  }
  0x24   :  { %282 = vsyncadd [#allocation3], 4294967040 }
  0x25   :  { %283 = dma.done.wait [#allocation6], 1024  }
  0x26   :  { %284 = vsyncadd [#allocation6], 4294966272  ;;  %v45_v0 = vld [vmem:[#allocation5] sm:$0xff]  ;;  %v46_v1 = vld [vmem:[#allocation5 + $0x8] sm:$0xff]  ;;  %vm60_vm0 = vcmask 523264   ;;  %s291_s11 = smov [#allocation7]  }
  0x27   :  { %v47_v2 = vld [vmem:[#allocation5 + $0x10] sm:$0xff]  ;;  %v194_v3 = vpack.c.bf16 %v46_v1, %v45_v0  ;;  %v48_v4 = vld [vmem:[#allocation5 + $0x18] sm:$0xff]  ;;  %v49_v6 = vld [vmem:[#allocation5 + $0x20] sm:$0xff]  ;;  %s149_s12 = sshll.u32 %s291_s11, 4  ;;  %s150_s12 = int_to_ptr.vmem [resolvable:$true] %s149_s12 }
  0x28   :  { %v198_v5 = vpack.c.bf16 %v48_v4, %v47_v2  ;;  %v50_v7 = vld [vmem:[#allocation5 + $0x28] sm:$0xff]  ;;  %v43_v8 = vld [vmem:[#allocation2] sm:$0xff]  ;;  %v52_v11 = vld [vmem:[#allocation5 + $0x38] sm:$0xff]  ;;  %s259_s13 = scalar_lea.vmem %s150_s12, 256  ;;  %p264_p3 = scmp.lt.s32.totalorder %s150_s12, %s150_s12 }
  0x29   :  { %195 = vmatprep.subr.bf16.mxu0 %v194_v3  ;;  %191 = vmatprep.mubr.msk.f32.mxu0 %vm60_vm0, %v43_v8  ;;  %v202_v9 = vpack.c.bf16 %v50_v7, %v49_v6  ;;  %v51_v10 = vld [vmem:[#allocation5 + $0x30] sm:$0xff]  ;;  %v44_v13 = vld [vmem:[#allocation2 + $0x8] sm:$0xff]  ;;  %p260_p2 = scmp.ne.s32.totalorder %s150_s12, %s259_s13  ;;  %p265_p4 = scmp.lt.s32.totalorder %s259_s13, %s259_s13 }
  0x2a   :  { %197 = vmatpush3.bf16.msra.mxu0 %v194_v3  ;;  %v206_v12 = vpack.c.bf16 %v52_v11, %v51_v10  ;;  %v162_v14 = vld [vmem:[%s366_s2] ss:$0 sm:$0xff] }
  0x2b   :  { %199 = vmatprep.subr.bf16.mxu0 %v198_v5  ;;  %p266_p5 = por %p265_p4, %p264_p3 }
  0x2d   :  { %p267_p6 = pnand %p266_p5, %p260_p2 }
  0x2e   :  { %201 = vmatpush3.bf16.msra.mxu0 %v198_v5 }
  0x2f   :  { %203 = vmatprep.subr.bf16.mxu0 %v202_v9 }
  0x32   :  { %205 = vmatpush3.bf16.msra.mxu0 %v202_v9 }
  0x33   :  { %207 = vmatprep.subr.bf16.mxu0 %v206_v12 }
  0x36   :  { %209 = vmatpush3.bf16.msra.mxu0 %v206_v12 }
  0x39   :  { %192 = vmatmul.mubr.msk.f32.vlgmr.msra.gmra.mrb[0].mxu0 %vm60_vm0, %v44_v13 }
 0x10c   :  { %v193_v15 = vpop.f32.mrb[0].mxu0 }
 0x10d   :  { %v139_v16 = vadd.f32 %v193_v15, %v162_v14  ;;  %v133_v17 = vpop.f32.mrb[1].mxu0 }
 0x10e   :  { %v134_v18 = vadd.f32 %v162_v14, %v133_v17 }
 0x10f   :  { %143 = vst.msk [vmem:[#allocation7 + $0x8] sm:$0xff] %vm60_vm0, %v139_v16 }
 0x110   :  { %142 = vst.msk [vmem:[#allocation7] sm:$0xff] %vm60_vm0, %v134_v18 }
 0x111   :  { %270 = shalt.err (!%p267_p6)
}
 0x112   :  { %s271_s15 = scalar_lea.hbm %s367_s3, 256 }
 0x113   :  { %p272_p7 = scmp.ne.s32.totalorder %s367_s3, %s271_s15  ;;  %p275_p8 = scmp.lt.u32.totalorder %s271_s15, %s367_s3 }
 0x115   :  { %p277_p9 = pnand %p275_p8, %p272_p7 }
 0x117   :  { %280 = shalt.err (!%p277_p9)
}
 0x118   :  { %155 = dma.vmem_to_hbm [thread:$0]  %s150_s12, 256, %s367_s3, [#allocation4], %s288_s22, %s288_s22, %s289_s23  }
 0x119   :  { %285 = dma.done.wait [#allocation4], 256  }
 0x11a   :  { %286 = vsyncadd [#allocation4], 4294967040 }
 0x11b   :  { %159 = vsyncpa [#allocation3], 1 }
 0x11c   :  { %160 = vsyncpa [#allocation6], 1 }
 0x11d   :  { %161 = vsyncpa [#allocation4], 1 }

</bundles_post_ra>
